<compile_context>
chip_gen: v7x
topology: tpu7x:2x2x1
jax: 0.10.0
libtpu: 0.0.40
codegen_flags: <defaults>
</compile_context>

<pallas_src>
import jax
import jax.numpy as jnp
from jax.experimental import pallas as pl
from jax.experimental.pallas import tpu as pltpu


# --------------------------------------------------------------------------- kernel

def ffn_kernel(x_ref, w1_ref, b1_ref, w2_ref, b2_ref, o_ref, acc_ref):
    # x_ref : (tm, dmodel)    token row-tile (resident across the hidden axis)
    # w1_ref: (dmodel, th)    W1 chunk for this hidden slice
    # b1_ref: (1, th)         b1 chunk
    # w2_ref: (th, dmodel)    W2 chunk
    # b2_ref: (1, dmodel)     b2 (constant across grid)
    # o_ref : (tm, dmodel)    output row-tile
    # acc_ref: (tm, dmodel)   f32 accumulator scratch
    h = pl.program_id(1)

    @pl.when(h == 0)
    def _init():
        acc_ref[...] = jnp.zeros_like(acc_ref)

    # First matmul chunk: (tm, dmodel) @ (dmodel, th) -> f32; bias + ReLU in f32 (VPU).
    hid = jnp.dot(x_ref[...], w1_ref[...], preferred_element_type=jnp.float32)
    hid = jnp.maximum(hid + b1_ref[...].astype(jnp.float32), 0.0)

    # Second matmul chunk, accumulated into the resident f32 scratch.
    acc_ref[...] += jnp.dot(hid.astype(w2_ref.dtype), w2_ref[...],
                            preferred_element_type=jnp.float32)

    @pl.when(h == pl.num_programs(1) - 1)
    def _finalize():
        o_ref[...] = (acc_ref[...] + b2_ref[...].astype(jnp.float32)).astype(o_ref.dtype)


# --------------------------------------------------------------------------- sizing helpers

def _round_up(x, m):
    return ((x + m - 1) // m) * m


def _cdiv(a, b):
    return (a + b - 1) // b


def _device_kind():
    try:
        return jax.devices()[0].device_kind.lower()
    except Exception:
        return ""


def _vmem_capacity_bytes():
    try:
        cap = int(pltpu.get_tpu_info().vmem_capacity_bytes)
        if cap > 0:
            return cap
    except Exception:
        pass
    kind = _device_kind()
    if "v7" in kind or "7x" in kind:
        return 64 << 20          # v7x: 64 MiB per TensorCore
    return 128 << 20             # v5e / v6e (and older): 128 MiB


def _num_tensorcores():
    kind = _device_kind()
    if any(tag in kind for tag in ("v7", "7x", "v4", "v5p")):
        return 2                 # megacore / dual-TC parts
    return 1


def _footprint_bytes(tm, th, dmodel, bx, bw, bb, bo):
    return (2 * tm * dmodel * bx        # x row-tile (double-buffered)
            + 2 * dmodel * th * bw      # W1 chunk   (double-buffered)
            + 2 * th * dmodel * bw      # W2 chunk   (double-buffered)
            + 2 * (th + dmodel) * bb    # bias chunks
            + 2 * tm * dmodel * bo      # output row-tile (double-buffered)
            + tm * dmodel * 4           # f32 accumulator scratch
            + tm * th * 4)              # live f32 hidden-chunk values


def _select_tiles(M, dmodel, hidden, bx, bw, bb, bo, budget, num_tc, tm, th):
    base_align = 16 if bx == 2 else 8

    # Hidden chunk: large, MXU-native multiples of 256 preferred; 128 fallback; full dim else.
    if th is None:
        for cand in (1024, 512, 256, 128):
            if hidden % cand == 0:
                th = cand
                break
        else:
            th = hidden

    # Row tile: big enough to amortize per-row-tile weight streaming past v6e's
    # ~680 bf16 flops/HBM-byte balance point; MXU-aligned (256) when M is large.
    if tm is None:
        row_align = 256 if M >= 256 else base_align
        tm_cap = 1024 if bx == 2 else 2048
        tm = min(_round_up(M, row_align), tm_cap)
        # Dual-TensorCore parts: keep grid[0] >= 2 so the "parallel" M axis actually
        # shards across cores instead of leaving one idle.
        if num_tc >= 2 and M > base_align:
            half = max(_round_up(_cdiv(M, num_tc), base_align), base_align)
            tm = min(tm, half)
    tm = max(_round_up(min(tm, _round_up(M, base_align)), base_align), base_align)

    # Solve the tiles down to the VMEM budget: th first (down to 256), then tm.
    min_th = 128 if hidden % 128 == 0 else hidden
    while _footprint_bytes(tm, th, dmodel, bx, bw, bb, bo) > budget:
        if th > 256 and th % 256 == 0:
            th //= 2
        elif tm > base_align:
            tm = max(_round_up(tm // 2, base_align), base_align)
        elif th > min_th and (th // 2) % 128 == 0:
            th //= 2
        else:
            break
    return tm, th


# --------------------------------------------------------------------------- wrapper

def feed_forward(x, w1, b1, w2, b2, *, tm=None, th=None, use_bf16_mxu=False):
    """x: [batch, seq, dmodel]; w1: [dmodel, 4*dmodel] (pre-transposed vs. PyTorch);
    w2: [4*dmodel, dmodel]; b1: [1, 4*dmodel]; b2: [1, dmodel]."""
    batch, seq, dmodel = x.shape
    hidden = w1.shape[1]
    M = batch * seq
    out_dtype = x.dtype
    x2d = x.reshape(M, dmodel)

    # Optional bf16 MXU passes for f32 models (f32 accumulation + f32 epilogue kept).
    if use_bf16_mxu and x.dtype == jnp.float32:
        x2d = x2d.astype(jnp.bfloat16)
        w1 = w1.astype(jnp.bfloat16)
        w2 = w2.astype(jnp.bfloat16)

    bx = jnp.dtype(x2d.dtype).itemsize
    bw = jnp.dtype(w1.dtype).itemsize
    bb = jnp.dtype(b1.dtype).itemsize
    bo = jnp.dtype(out_dtype).itemsize

    # Generation-aware VMEM budget (~85% of physical: ~108 MiB v5e/v6e, ~54 MiB v7x).
    cap = _vmem_capacity_bytes()
    budget = max(int(cap * 0.85), 32 << 20)
    num_tc = _num_tensorcores()

    tm, th = _select_tiles(M, dmodel, hidden, bx, bw, bb, bo, budget, num_tc, tm, th)
    assert hidden % th == 0, "hidden tile must divide the hidden dimension"
    assert th % 128 == 0 or th == hidden, "hidden tile must be a multiple of 128 (or == hidden)"

    grid = (_cdiv(M, tm), hidden // th)

    footprint = _footprint_bytes(tm, th, dmodel, bx, bw, bb, bo)
    # Normally footprint <= budget (solver guarantees it); keep a best-effort escape hatch.
    vmem_limit = int(min(max(budget, int(footprint * 1.2)), cap))

    # Cost hint: weights (and biases) are re-streamed once per row tile.
    grid_m = grid[0]
    flops = 4 * M * dmodel * hidden  # two matmuls, 2 flops/MAC each
    bytes_accessed = int(
        M * dmodel * bx                                       # x read
        + M * dmodel * bo                                     # out write
        + grid_m * (dmodel * hidden + hidden * dmodel) * bw   # W1 + W2 per row tile
        + grid_m * (hidden + dmodel) * bb)                    # biases per row tile
    cost = pl.CostEstimate(flops=flops, transcendentals=0, bytes_accessed=bytes_accessed)

    out2d = pl.pallas_call(
        ffn_kernel,
        out_shape=jax.ShapeDtypeStruct((M, dmodel), out_dtype),
        grid_spec=pltpu.PrefetchScalarGridSpec(
            num_scalar_prefetch=0,
            grid=grid,
            in_specs=[
                pl.BlockSpec((tm, dmodel), lambda i, h: (i, 0)),   # x row-tile (resident over h)
                pl.BlockSpec((dmodel, th), lambda i, h: (0, h)),   # W1 chunk
                pl.BlockSpec((1, th), lambda i, h: (0, h)),        # b1 chunk
                pl.BlockSpec((th, dmodel), lambda i, h: (h, 0)),   # W2 chunk
                pl.BlockSpec((1, dmodel), lambda i, h: (0, 0)),    # b2 (resident)
            ],
            out_specs=pl.BlockSpec((tm, dmodel), lambda i, h: (i, 0)),
            scratch_shapes=[pltpu.VMEM((tm, dmodel), jnp.float32)],
        ),
        compiler_params=pltpu.CompilerParams(
            dimension_semantics=("parallel", "arbitrary"),
            vmem_limit_bytes=vmem_limit,
        ),
        cost_estimate=cost,
    )(x2d, w1, b1, w2, b2)

    return out2d.reshape(batch, seq, dmodel)


# --------------------------------------------------------------------------- params / test

def init_params(key, dmodel, dtype=jnp.float32):
    """Deterministic init mimicking nn.Linear defaults (uniform +-1/sqrt(fan_in)).
    Weights returned pre-transposed to [in, out]."""
    hidden = dmodel * 4
    k1, k2, k3, k4 = jax.random.split(key, 4)
    bound1 = 1.0 / jnp.sqrt(dmodel)
    bound2 = 1.0 / jnp.sqrt(hidden)
    w1 = jax.random.uniform(k1, (dmodel, hidden), jnp.float32, -bound1, bound1).astype(dtype)
    b1 = jax.random.uniform(k2, (1, hidden), jnp.float32, -bound1, bound1).astype(dtype)
    w2 = jax.random.uniform(k3, (hidden, dmodel), jnp.float32, -bound2, bound2).astype(dtype)
    b2 = jax.random.uniform(k4, (1, dmodel), jnp.float32, -bound2, bound2).astype(dtype)
    return w1, b1, w2, b2


if __name__ == "__main__":
    # Small but lane-dense shapes: dmodel=128 -> hidden=512, M = batch*seq = 16 tokens.
    batch, seq, dmodel = 2, 8, 128
    key = jax.random.PRNGKey(0)
    kx, kp = jax.random.split(key)
    x = jax.random.normal(kx, (batch, seq, dmodel), jnp.float32)
    w1, b1, w2, b2 = init_params(kp, dmodel)

    # Pure-JAX reference (dropout == identity in eval mode).
    ref = jnp.maximum(x.reshape(-1, dmodel) @ w1 + b1, 0.0) @ w2 + b2
    ref = ref.reshape(batch, seq, dmodel)

    # 1) Explicit small tiles: exercises a multi-program grid on both axes
    #    (M axis pipelined/parallel, hidden axis accumulated in the f32 scratch).
    out = feed_forward(x, w1, b1, w2, b2, tm=8, th=128)
    out = jax.block_until_ready(out)
    assert out.shape == (batch, seq, dmodel)
    assert jnp.allclose(out, ref, atol=1e-5, rtol=1e-5)

    # 2) Default (generation-aware) tile selection path.
    out_default = jax.block_until_ready(feed_forward(x, w1, b1, w2, b2))
    assert jnp.allclose(out_default, ref, atol=1e-5, rtol=1e-5)

    # 3) bf16-MXU path (f32 accumulate / f32 epilogue): looser tolerance for bf16 operands.
    out_bf16 = jax.block_until_ready(feed_forward(x, w1, b1, w2, b2, use_bf16_mxu=True))
    assert jnp.allclose(out_bf16, ref, atol=5e-2, rtol=5e-2)

    print("KERNEL_OK")
</pallas_src>

<mosaic_0001>
module attributes {stable_mosaic.version = 11 : i64} {
  func.func @ffn_kernel(%arg0: i32, %arg1: i32, %arg2: memref<8x128xf32, #tpu.memory_space<vmem>>, %arg3: memref<128x128xf32, #tpu.memory_space<vmem>>, %arg4: memref<1x128xf32, #tpu.memory_space<vmem>>, %arg5: memref<128x128xf32, #tpu.memory_space<vmem>>, %arg6: memref<1x128xf32, #tpu.memory_space<vmem>>, %arg7: memref<8x128xf32, #tpu.memory_space<vmem>>, %arg8: memref<8x128xf32, #tpu.memory_space<vmem>>) attributes {dimension_semantics = [#tpu.dimension_semantics<parallel>, #tpu.dimension_semantics<arbitrary>], iteration_bounds = array<i64: 2, 4>, scalar_prefetch = 0 : i64, scratch_operands = 1 : i64, tpu.core_type = #tpu.core_type<tc>, window_params = [{transform_indices = @transform_0, window_bounds = array<i64: 8, 128>}, {transform_indices = @transform_1, window_bounds = array<i64: 128, 128>}, {transform_indices = @transform_2, window_bounds = array<i64: 1, 128>}, {transform_indices = @transform_3, window_bounds = array<i64: 128, 128>}, {pipeline_mode = #tpu.pipeline_mode<synchronous>, transform_indices = @transform_4, window_bounds = array<i64: 1, 128>}, {transform_indices = @transform_5, window_bounds = array<i64: 8, 128>}]} {
    %c0_i32 = arith.constant 0 : i32
    %0 = arith.cmpi eq, %arg1, %c0_i32 : i32
    %1 = arith.extui %0 : i1 to i32
    %c0_i32_0 = arith.constant 0 : i32
    %2 = arith.cmpi ne, %1, %c0_i32_0 : i32
    scf.if %2 {
      %cst_15 = arith.constant 0.000000e+00 : f32
      %19 = vector.broadcast %cst_15 : f32 to vector<8x128xf32>
      %c0_16 = arith.constant 0 : index
      %c0_17 = arith.constant 0 : index
      %20 = vector.load %arg8[%c0_16, %c0_17] : memref<8x128xf32, #tpu.memory_space<vmem>>, vector<8x128xf32>
      tpu.vector_store %arg8[%c0_16, %c0_17], %19 {strides = array<i32>} : memref<8x128xf32, #tpu.memory_space<vmem>>, vector<8x128xf32>,
    } else {
    }
    %c0 = arith.constant 0 : index
    %c0_1 = arith.constant 0 : index
    %3 = vector.load %arg2[%c0, %c0_1] : memref<8x128xf32, #tpu.memory_space<vmem>>, vector<8x128xf32>
    %c0_2 = arith.constant 0 : index
    %c0_3 = arith.constant 0 : index
    %4 = vector.load %arg3[%c0_2, %c0_3] : memref<128x128xf32, #tpu.memory_space<vmem>>, vector<128x128xf32>
    %cst = arith.constant dense<0.000000e+00> : vector<8x128xf32>
    %5 = tpu.matmul %3, %4, %cst {dimension_numbers = #tpu.dot_dimension_numbers<[1], [0], [0], [1], [0, 0, 1, 1], [], []>} : vector<8x128xf32>, vector<128x128xf32>, vector<8x128xf32> -> vector<8x128xf32>
    %c0_4 = arith.constant 0 : index
    %c0_5 = arith.constant 0 : index
    %6 = vector.load %arg4[%c0_4, %c0_5] : memref<1x128xf32, #tpu.memory_space<vmem>>, vector<1x128xf32>
    %7 = vector.broadcast %6 : vector<1x128xf32> to vector<8x128xf32>
    %8 = arith.addf %5, %7 : vector<8x128xf32>
    %cst_6 = arith.constant 0.000000e+00 : f32
    %9 = vector.broadcast %cst_6 : f32 to vector<8x128xf32>
    %10 = arith.maximumf %8, %9 : vector<8x128xf32>
    %c0_7 = arith.constant 0 : index
    %c0_8 = arith.constant 0 : index
    %11 = vector.load %arg8[%c0_7, %c0_8] : memref<8x128xf32, #tpu.memory_space<vmem>>, vector<8x128xf32>
    %c0_9 = arith.constant 0 : index
    %c0_10 = arith.constant 0 : index
    %12 = vector.load %arg5[%c0_9, %c0_10] : memref<128x128xf32, #tpu.memory_space<vmem>>, vector<128x128xf32>
    %cst_11 = arith.constant dense<0.000000e+00> : vector<8x128xf32>
    %13 = tpu.matmul %10, %12, %cst_11 {dimension_numbers = #tpu.dot_dimension_numbers<[1], [0], [0], [1], [0, 0, 1, 1], [], []>} : vector<8x128xf32>, vector<128x128xf32>, vector<8x128xf32> -> vector<8x128xf32>
    %14 = arith.addf %11, %13 : vector<8x128xf32>
    %c0_12 = arith.constant 0 : index
    %c0_13 = arith.constant 0 : index
    %15 = vector.load %arg8[%c0_12, %c0_13] : memref<8x128xf32, #tpu.memory_space<vmem>>, vector<8x128xf32>
    tpu.vector_store %arg8[%c0_12, %c0_13], %14 {strides = array<i32>} : memref<8x128xf32, #tpu.memory_space<vmem>>, vector<8x128xf32>,
    %c3_i32 = arith.constant 3 : i32
    %16 = arith.cmpi eq, %arg1, %c3_i32 : i32
    %17 = arith.extui %16 : i1 to i32
    %c0_i32_14 = arith.constant 0 : i32
    %18 = arith.cmpi ne, %17, %c0_i32_14 : i32
    scf.if %18 {
      %c0_15 = arith.constant 0 : index
      %c0_16 = arith.constant 0 : index
      %19 = vector.load %arg8[%c0_15, %c0_16] : memref<8x128xf32, #tpu.memory_space<vmem>>, vector<8x128xf32>
      %c0_17 = arith.constant 0 : index
      %c0_18 = arith.constant 0 : index
      %20 = vector.load %arg6[%c0_17, %c0_18] : memref<1x128xf32, #tpu.memory_space<vmem>>, vector<1x128xf32>
      %21 = vector.broadcast %20 : vector<1x128xf32> to vector<8x128xf32>
      %22 = arith.addf %19, %21 : vector<8x128xf32>
      %c0_19 = arith.constant 0 : index
      %c0_20 = arith.constant 0 : index
      %23 = vector.load %arg7[%c0_19, %c0_20] : memref<8x128xf32, #tpu.memory_space<vmem>>, vector<8x128xf32>
      tpu.vector_store %arg7[%c0_19, %c0_20], %22 {strides = array<i32>} : memref<8x128xf32, #tpu.memory_space<vmem>>, vector<8x128xf32>,
    } else {
    }
    return
  }
  func.func @transform_0(%arg0: i32, %arg1: i32) -> (i32, i32) {
    %c0_i32 = arith.constant 0 : i32
    %c0_i32_0 = arith.constant 0 : i32
    return %arg0, %c0_i32 : i32, i32
  }
  func.func @transform_1(%arg0: i32, %arg1: i32) -> (i32, i32) {
    %c0_i32 = arith.constant 0 : i32
    %c0_i32_0 = arith.constant 0 : i32
    return %c0_i32, %arg1 : i32, i32
  }
  func.func @transform_2(%arg0: i32, %arg1: i32) -> (i32, i32) {
    %c0_i32 = arith.constant 0 : i32
    %c0_i32_0 = arith.constant 0 : i32
    return %c0_i32, %arg1 : i32, i32
  }
  func.func @transform_3(%arg0: i32, %arg1: i32) -> (i32, i32) {
    %c0_i32 = arith.constant 0 : i32
    %c0_i32_0 = arith.constant 0 : i32
    return %arg1, %c0_i32 : i32, i32
  }
  func.func @transform_4(%arg0: i32, %arg1: i32) -> (i32, i32) {
    %c0_i32 = arith.constant 0 : i32
    %c0_i32_0 = arith.constant 0 : i32
    %c0_i32_1 = arith.constant 0 : i32
    return %c0_i32, %c0_i32_0 : i32, i32
  }
  func.func @transform_5(%arg0: i32, %arg1: i32) -> (i32, i32) {
    %c0_i32 = arith.constant 0 : i32
    %c0_i32_0 = arith.constant 0 : i32
    return %arg0, %c0_i32 : i32, i32
  }
}

</mosaic_0001>

<bundles_post_ra>
// kernel: tpu_custom_call.1
= control target key start
LH: loop header
LB: loop body
LE: loop exit
PB: predicated region body
PF: predicated region fallthrough
CT: control target
= control target key end

     0   :  { %s1858_s0 = inlined_call_operand.hbm [shape: f32[16,128], index: 0, kind: input, shape index: {}]   ;;  %s1859_s1 = inlined_call_operand.hbm [shape: f32[128,512], index: 1, kind: input, shape index: {}]   ;;  %s1860_s2 = inlined_call_operand.hbm [shape: f32[1,512], index: 2, kind: input, shape index: {}]   ;;  %s1861_s3 = inlined_call_operand.hbm [shape: f32[512,128], index: 3, kind: input, shape index: {}]   ;;  %s1862_s4 = inlined_call_operand.hbm [shape: f32[1,128], index: 4, kind: input, shape index: {}]   ;;  %s1863_s5 = inlined_call_operand.hbm [shape: f32[16,128], index: 5, kind: output, shape index: {}]  }
   0x1   :  { %1888 = sst [smem:[#allocation30_spill]] %s1859_s1 }
   0x2   :  { %1889 = sst [smem:[#allocation31_spill]] %s1862_s4 }
   0x3   :  { %1890 = sst [smem:[#allocation32_spill]] %s1863_s5 }
   0x4   :  { %10 = vsyncpa [#allocation4], 0 }
   0x5   :  { %12 = vsyncpa [#allocation4 + $0x1], 0 }
   0x6   :  { %13 = vsyncpa [#allocation7], 0 }
   0x7   :  { %15 = vsyncpa [#allocation7 + $0x1], 0 }
   0x8   :  { %16 = vsyncpa [#allocation10], 0 }
   0x9   :  { %18 = vsyncpa [#allocation10 + $0x1], 0 }
   0xa   :  { %19 = vsyncpa [#allocation5], 0 }
   0xb   :  { %21 = vsyncpa [#allocation5 + $0x1], 0  ;;  %s1387_s18 = smov 0   ;;  %s1389_s19 = smov 0  }
   0xc   :  { %s1391_s20 = smov 0   ;;  %s1393_s21 = smov 0  }
   0xd   :  { %s1395_s22 = smov 0   ;;  %s1397_s23 = smov 0  }
   0xe   :  { %s1399_s24 = smov 0   ;;  %s1401_s25 = smov 0  }
   0xf   :  { %s1403_s26 = smov 0   ;;  %s1405_s27 = smov 0  }
  0x10   :  { %s1407_s28 = smov 0  }
  0x11 LB: > { %1891 = sst [smem:[#allocation18_spill]] %s1306_s19  ;;  %s1441_s29 = sadd.s32 4294967295, %s1342_s28   ;;  %s1342_s28 = sphi %s1407_s28, %s27_s28   ;;  %s1338_s27 = sphi %s1405_s27, %s1949_s27   ;;  %s1334_s26 = sphi %s1403_s26, %s1955_s26   ;;  %s1330_s25 = sphi %s1401_s25, %s1947_s25   ;;  %s1326_s24 = sphi %s1399_s24, %s1954_s24   ;;  %s1322_s23 = sphi %s1397_s23, %s1946_s23   ;;  %s1318_s22 = sphi %s1395_s22, %s1953_s22   ;;  %s1314_s21 = sphi %s1393_s21, %s1952_s21   ;;  %s1310_s20 = sphi %s1391_s20, %s1951_s20   ;;  %s1306_s19 = sphi %s1389_s19, %s1950_s19   ;;  %s1302_s18 = sphi %s1387_s18, %s1944_s18  }
  0x12   : > { %1892 = sst [smem:[#allocation19_spill]] %s1314_s21  ;;  %s746_s30 = sadd.s32 4294967294, %s1342_s28  }
  0x13   : > { %1893 = sst [smem:[#allocation20_spill]] %s1322_s23  ;;  %p1867_p0 = scmp.eq.s32.totalorder %s1342_s28, 0 }
  0x14   : > { %1894 = sst [smem:[#allocation21_spill]] %s1326_s24  ;;  %p59_p1 = scmp.ne.s32.totalorder %s1318_s22, %s1314_s21 }
  0x15   : > { %1895 = sst [smem:[#allocation22_spill]] %s1330_s25  ;;  %p1864_p2 = scmp.eq.s32.totalorder %s1441_s29, 0 }
  0x16   : > { %1896 = sst [smem:[#allocation23_spill]] %s1338_s27  ;;  %p79_p3 = scmp.ne.s32.totalorder %s1310_s20, %s1306_s19 }
  0x17   : > { %1897 = sst [smem:[#allocation24_spill]] %s1441_s29  ;;  %p85_p4 = scmp.ne.s32.totalorder %s1306_s19, %s1302_s18 }
  0x18   : > { %p1454_p5 = por %p1864_p2, %p59_p1  ;;  %p1461_p7 = por %p79_p3, %p1867_p0 }
  0x19   : > { %p1467_p8 = por %p85_p4, %p1864_p2  ;;  %p188_p9 = scmp.eq.s32.totalorder %s746_s30, 7 }
  0x1a   : > { %s1898_s7 = scalar_select %p1454_p5, 1, 0 }
  0x1b   : > { %s1900_s9 = scalar_select %p1467_p8, 1, 0 }
  0x1c   : > { %p747_p10 = scmp.ge.s32.totalorder %s1342_s28, 1  ;;  %p195_p11 = scmp.lt.s32.totalorder %s1342_s28, 9 }
  0x1d   : > { %1901 = sst [smem:[#allocation25_spill]] %s1900_s9  ;;  %p1473_p12 = por %p188_p9, %p59_p1 }
  0x1e   : > { %p1477_p13 = pnand %p747_p10, %p195_p11  ;;  %s1344_s12 = smov [#allocation11]  }
  0x1f   : > { %s1902_s10 = scalar_select %p1473_p12, 1, 0 }
  0x20   : > { %s1904_s11 = scalar_select %p1477_p13, 1, 0 }
  0x21   : > { %1903 = sst [smem:[#allocation26_spill]] %s1902_s10  ;;  %s208_s13 = sshll.u32 %s1344_s12, 4  ;;  %s209_s13 = int_to_ptr.vmem [resolvable:$true] %s208_s13 }
  0x22   : > { %p939_p3 = pneg %p1477_p13  ;;  %p1866_p4 = scmp.lt.s32.totalorder %s1342_s28, 8 }
  0x23   : > { %s1907_s4 = sld [smem:[#allocation31_spill]] }
  0x24   : > { %p1487_p6 = pnand %p939_p3, %p1864_p2  ;;  %p1495_p1 = pnand %p1866_p4, %p1461_p7 }
  0x26   : > { %s1906_s16 = scalar_select %p1495_p1, 1, 0 }
  0x27   : > { %p1062_p10 = pneg %p1487_p6 }
  0x29   : > { %s1060_s30 = scalar_lea.hbm %s1907_s4, 16 }
  0x2a   : > { %p1061_p9 = scmp.ne.s32.totalorder %s1907_s4, %s1060_s30  ;;  %p1067_p2 = scmp.lt.u32.totalorder %s1060_s30, %s1907_s4 }
  0x2c   : > { %p1063_p11 = pnand %p1062_p10, %p1061_p9 }
  0x2e   : > { %p1064_p3 = pneg %p1063_p11 }
  0x30   : > { %p1069_p7 = pnand %p1067_p2, %p1064_p3 }
  0x32   : > { %1072 = shalt.err (!%p1069_p7)
}
  0x33   : > { %s1073_s10 = scalar_lea.vmem %s209_s13, 16  ;;  %s1080_s17 = scalar_lea.vmem %s209_s13, 32 }
  0x34   : > { %p1074_p4 = scmp.ne.s32.totalorder %s209_s13, %s1073_s10  ;;  %p1081_p8 = scmp.lt.s32.totalorder %s209_s13, %s209_s13 }
  0x35   : > { %p1082_p5 = scmp.lt.s32.totalorder %s1080_s17, %s1073_s10 }
  0x36   : > { %p1076_p0 = pnand %p1074_p4, %p1062_p10 }
  0x37   : > { %p1083_p13 = por %p1082_p5, %p1081_p8 }
  0x38   : > { %p1077_p12 = pneg %p1076_p0 }
  0x3a   : > { %p1084_p1 = pnand %p1083_p13, %p1077_p12 }
  0x3c   : > { %1087 = shalt.err (!%p1084_p1)
}
  0x3d   : > { %942 = dma.hbm_to_vmem [thread:$0]  (!%p1487_p6), %s1907_s4, 16, %s209_s13, [#allocation10]  }
  0x3e   : > { %s1872_s14 = sand.u32 1, %s1310_s20   ;;  %s753_s30 = sshll.u32 %s1334_s26, 7 }
  0x3f   : > { %s1519_s12 = sshll.u32 %s1872_s14, 7  ;;  %s1908_s1 = sld [smem:[#allocation30_spill]] }
  0x40   : > { %s241_s15 = scalar_lea.vmem [#allocation6], %s1519_s12  ;;  %s1909_s13 = sand.u32 1, %s1342_s28  }
  0x41   : > { %s247_s6 = sshll.u32 %s241_s15, 4  ;;  %s1531_s18 = scalar_lea.sflag [#allocation7], %s1909_s13  ;;  %s1527_s6 = int_to_ptr.vmem [resolvable:$true] %s247_s6 }
  0x42   : > { %p1910_p2 = scmp.ne.s32.totalorder %s1906_s16, 0 }
  0x44   : > { %p1537_p5 = pneg %p1910_p2 }
  0x45   : > { %s1524_s17 = scalar_lea.hbm %s1908_s1, %s753_s30  ;;  %s1093_s8 = scalar_lea.hbm %s1908_s1, 8192 }
  0x46   : > { %s1088_s4 = scalar_lea.hbm %s1524_s17, 2048  ;;  %p1094_p12 = scmp.lt.u32.totalorder %s1524_s17, %s1908_s1 }
  0x47   : > { %p1089_p0 = scmp.ne.s32.totalorder %s1524_s17, %s1088_s4  ;;  %p1095_p13 = scmp.lt.u32.totalorder %s1093_s8, %s1088_s4 }
  0x48   : > { %p1097_p1 = scmp.lt.u32.totalorder %s1088_s4, %s1524_s17 }
  0x49   : > { %p1091_p6 = pnand %p1537_p5, %p1089_p0  ;;  %p1096_p4 = por %p1095_p13, %p1094_p12 }
  0x4b   : > { %p1092_p8 = pneg %p1091_p6  ;;  %p1098_p9 = por %p1097_p1, %p1096_p4 }
  0x4d   : > { %p1099_p10 = pnand %p1098_p9, %p1092_p8 }
  0x4f   : > { %1102 = shalt.err (!%p1099_p10)
}
  0x50   : > { %s1103_s13 = scalar_lea.vmem %s1527_s6, 2048  ;;  %s1345_s30 = smov [#allocation6]  }
  0x51   : > { %p1104_p11 = scmp.ne.s32.totalorder %s1527_s6, %s1103_s13  ;;  %s1108_s10 = sshll.u32 %s1345_s30, 4  ;;  %s1109_s10 = int_to_ptr.vmem [resolvable:$false] %s1108_s10 }
  0x52   : > { %s1110_s21 = scalar_lea.vmem %s1109_s10, 4096  ;;  %p1111_p0 = scmp.lt.s32.totalorder %s1527_s6, %s1109_s10 }
  0x53   : > { %p1106_p3 = pnand %p1104_p11, %p1537_p5  ;;  %p1112_p6 = scmp.lt.s32.totalorder %s1110_s21, %s1103_s13 }
  0x55   : > { %p1107_p7 = pneg %p1106_p3  ;;  %p1113_p12 = por %p1112_p6, %p1111_p0 }
  0x57   : > { %p1114_p13 = pnand %p1113_p12, %p1107_p7 }
  0x59   : > { %1117 = shalt.err (!%p1114_p13)
}
  0x5a   : > { %s1346_s4 = smov 512   ;;  %s1874_s8 = smov 128  }
  0x5b   : > { %s1875_s15 = smov 8   ;;  %s36_s13 = sadd.s32 1, %s1334_s26 }
  0x5c   : > { %949 = dma.hbm_to_vmem [thread:$0]  (!%p1910_p2), %s1524_s17, 2048, %s1527_s6, %s1531_s18, %s1346_s4, %s1874_s8, %s1875_s15  }
  0x5d   : > { %s39_s30 = sadd.s32 1, %s1338_s27  ;;  %p37_p8 = scmp.ge.s32.totalorder %s36_s13, 4 }
  0x5e   : > { %s46_s10 = sadd.s32 1, %s1322_s23  ;;  %p53_p4 = scmp.ne.s32.totalorder %s1322_s23, %s1318_s22 }
  0x5f   : > { %s219_s21 = sand.u32 1, %s1322_s23   ;;  %s1957_s13 = smov (%p37_p8, %s36_s13), 0 }
  0x60   : > { %1912 = sst [smem:[#allocation27_spill]] %s1957_s13  ;;  %s1959_s30 = smov (!%p37_p8, %s39_s30), %s1338_s27 }
  0x61   : > { %p1913_p1 = scmp.eq.s32.totalorder %s1342_s28, 0  ;;  %s69_s17 = ssub.s32 %s1334_s26, %s1957_s13 }
  0x62   : > { %p41_p10 = scmp.ge.s32.totalorder %s1959_s30, 2  ;;  %p70_p11 = scmp.eq.s32.totalorder %s69_s17, 0 }
  0x63   : > { %p1574_p9 = por %p1913_p1, %p53_p4  ;;  %p1915_p3 = scmp.eq.s32.totalorder %s1441_s29, 7 }
  0x64   : > { %s1961_s30 = smov (%p41_p10, %s1959_s30), 0  ;;  %s1918_s4 = sadd.s32 1, %s1310_s20 }
  0x65   : > { %p1582_p7 = por %p1915_p3, %p53_p4  ;;  %1917 = sst [smem:[#allocation28_spill]] %s1961_s30 }
  0x66   : > { %s1591_s8 = scalar_select %p70_p11, %s1310_s20, %s1918_s4  }
  0x67   : > { %s1916_s6 = scalar_select %p1582_p7, 1, 0 }
  0x68   : > { %s43_s15 = ssub.s32 %s1338_s27, %s1961_s30  ;;  %s750_s5 = sshll.u32 %s219_s21, 3 }
  0x69   : > { %p44_p0 = scmp.eq.s32.totalorder %s43_s15, 0  ;;  %s751_s25 = sshll.u32 %s1338_s27, 7 }
  0x6a   : > { %s223_s13 = scalar_lea.vmem [#allocation3], %s750_s5  ;;  %s1602_s29 = scalar_lea.hbm %s1858_s0, %s751_s25 }
  0x6b   : > { %s230_s24 = sshll.u32 %s223_s13, 4  ;;  %p1920_p6 = scmp.lt.s32.totalorder %s1342_s28, 8  ;;  %s1604_s24 = int_to_ptr.vmem [resolvable:$true] %s230_s24 }
  0x6c   : > { %s1597_s9 = scalar_select %p44_p0, %s1322_s23, %s46_s10  }
  0x6d   : > { %p1610_p12 = pnand %p1920_p6, %p1574_p9  ;;  %s754_s5 = sshll.u32 %s1334_s26, 4 }
  0x6e   : > { %1919 = sst [smem:[#allocation29_spill]] %s1597_s9  ;;  %s1922_s13 = sand.u32 1, %s1310_s20  }
  0x6f   : > { %s1617_s10 = scalar_lea.vmem [#allocation8], %s1922_s13  ;;  %s1623_s17 = scalar_lea.hbm %s1860_s2, %s754_s5 }
  0x70   : > { %s220_s1 = scalar_lea.sflag [#allocation4], %s219_s21  ;;  %s1118_s30 = scalar_lea.hbm %s1602_s29, 128 }
  0x71   : > { %p1119_p13 = scmp.ne.s32.totalorder %s1602_s29, %s1118_s30  ;;  %p1120_p8 = pneg %p1610_p12 }
  0x72   : > { %s1123_s13 = scalar_lea.hbm %s1858_s0, 256  ;;  %p1124_p9 = scmp.lt.u32.totalorder %s1602_s29, %s1858_s0 }
  0x73   : > { %p1121_p4 = pnand %p1120_p8, %p1119_p13  ;;  %p1125_p10 = scmp.lt.u32.totalorder %s1123_s13, %s1118_s30 }
  0x74   : > { %p1127_p3 = scmp.lt.u32.totalorder %s1118_s30, %s1602_s29 }
  0x75   : > { %p1122_p1 = pneg %p1121_p4  ;;  %p1126_p11 = por %p1125_p10, %p1124_p9 }
  0x77   : > { %p1128_p0 = por %p1127_p3, %p1126_p11 }
  0x79   : > { %p1129_p6 = pnand %p1128_p0, %p1122_p1 }
  0x7b   : > { %1132 = shalt.err (!%p1129_p6)
}
  0x7c   : > { %s1133_s21 = scalar_lea.vmem %s1604_s24, 128  ;;  %s1349_s27 = smov [#allocation3]  }
  0x7d   : > { %p1134_p13 = scmp.ne.s32.totalorder %s1604_s24, %s1133_s21  ;;  %s1138_s9 = sshll.u32 %s1349_s27, 4  ;;  %s1139_s9 = int_to_ptr.vmem [resolvable:$false] %s1138_s9 }
  0x7e   : > { %s1140_s23 = scalar_lea.vmem %s1139_s9, 256  ;;  %p1141_p2 = scmp.lt.s32.totalorder %s1604_s24, %s1139_s9 }
  0x7f   : > { %p1136_p4 = pnand %p1134_p13, %p1120_p8  ;;  %p1142_p9 = scmp.lt.s32.totalorder %s1140_s23, %s1133_s21 }
  0x81   : > { %p1137_p7 = pneg %p1136_p4  ;;  %p1143_p10 = por %p1142_p9, %p1141_p2 }
  0x83   : > { %p1144_p11 = pnand %p1143_p10, %p1137_p7 }
  0x85   : > { %1147 = shalt.err (!%p1144_p11)
}
  0x86   : > { %946 = dma.hbm_to_vmem [thread:$0]  (!%p1610_p12), %s1602_s29, 128, %s1604_s24, %s220_s1  }
  0x87   : > { %s1923_s30 = sshll.u32 %s1617_s10, 4  ;;  %s1148_s5 = scalar_lea.hbm %s1623_s17, 16  ;;  %s268_s30 = int_to_ptr.vmem [resolvable:$true] %s1923_s30 }
  0x88   : > { %p1149_p8 = scmp.ne.s32.totalorder %s1623_s17, %s1148_s5  ;;  %s1153_s15 = scalar_lea.hbm %s1860_s2, 64 }
  0x89   : > { %p1154_p7 = scmp.lt.u32.totalorder %s1623_s17, %s1860_s2  ;;  %p1155_p3 = scmp.lt.u32.totalorder %s1153_s15, %s1148_s5 }
  0x8a   : > { %p1151_p1 = pnand %p1149_p8, %p1537_p5  ;;  %p1157_p6 = scmp.lt.u32.totalorder %s1148_s5, %s1623_s17 }
  0x8b   : > { %p1156_p0 = por %p1155_p3, %p1154_p7 }
  0x8c   : > { %p1152_p2 = pneg %p1151_p1 }
  0x8d   : > { %p1158_p13 = por %p1157_p6, %p1156_p0 }
  0x8f   : > { %p1159_p12 = pnand %p1158_p13, %p1152_p2 }
  0x91   : > { %1162 = shalt.err (!%p1159_p12)
}
  0x92   : > { %s1163_s24 = scalar_lea.vmem %s268_s30, 16  ;;  %s1350_s29 = smov [#allocation8]  }
  0x93   : > { %p1164_p4 = scmp.ne.s32.totalorder %s268_s30, %s1163_s24  ;;  %s1168_s10 = sshll.u32 %s1350_s29, 4  ;;  %s1169_s10 = int_to_ptr.vmem [resolvable:$false] %s1168_s10 }
  0x94   : > { %s1170_s1 = scalar_lea.vmem %s1169_s10, 32  ;;  %p1171_p11 = scmp.lt.s32.totalorder %s268_s30, %s1169_s10 }
  0x95   : > { %p1166_p9 = pnand %p1164_p4, %p1537_p5  ;;  %p1172_p8 = scmp.lt.s32.totalorder %s1170_s1, %s1163_s24 }
  0x97   : > { %p1167_p10 = pneg %p1166_p9  ;;  %p1173_p1 = por %p1172_p8, %p1171_p11 }
  0x99   : > { %p1174_p3 = pnand %p1173_p1, %p1167_p10 }
  0x9b   : > { %1177 = shalt.err (!%p1174_p3)
}
  0x9c   : > { %p1924_p7 = scmp.ne.s32.totalorder %s1906_s16, 0  ;;  %s772_s21 = sshll.u32 %s1334_s26, 11 }
  0x9d   : > { %s1674_s23 = scalar_lea.hbm %s1861_s3, %s772_s21  ;;  %s278_s5 = scalar_lea.vmem [#allocation9], %s1519_s12 }
  0x9e   : > { %952 = dma.hbm_to_vmem [thread:$0]  (!%p1924_p7), %s1623_s17, 16, %s268_s30, %s1531_s18  }
  0x9f   : > { %s285_s19 = sshll.u32 %s278_s5, 4  ;;  %s1925_s25 = sand.u32 1, %s1342_s28   ;;  %s1677_s19 = int_to_ptr.vmem [resolvable:$true] %s285_s19 }
  0xa0   : > { %s1681_s15 = scalar_lea.sflag [#allocation10], %s1925_s25  ;;  %s1178_s4 = scalar_lea.hbm %s1674_s23, 2048 }
  0xa1   : > { %p1179_p2 = scmp.ne.s32.totalorder %s1674_s23, %s1178_s4  ;;  %s1183_s30 = scalar_lea.hbm %s1861_s3, 8192 }
  0xa2   : > { %p1184_p13 = scmp.lt.u32.totalorder %s1674_s23, %s1861_s3  ;;  %p1185_p12 = scmp.lt.u32.totalorder %s1183_s30, %s1178_s4 }
  0xa3   : > { %p1181_p0 = pnand %p1179_p2, %p1537_p5  ;;  %p1187_p9 = scmp.lt.u32.totalorder %s1178_s4, %s1674_s23 }
  0xa4   : > { %p1186_p4 = por %p1185_p12, %p1184_p13 }
  0xa5   : > { %p1182_p6 = pneg %p1181_p0 }
  0xa6   : > { %p1188_p10 = por %p1187_p9, %p1186_p4 }
  0xa8   : > { %p1189_p11 = pnand %p1188_p10, %p1182_p6 }
  0xaa   : > { %1192 = shalt.err (!%p1189_p11)
}
  0xab   : > { %s1193_s12 = scalar_lea.vmem %s1677_s19, 2048  ;;  %s1351_s29 = smov [#allocation9]  }
  0xac   : > { %p1194_p8 = scmp.ne.s32.totalorder %s1677_s19, %s1193_s12  ;;  %s1198_s10 = sshll.u32 %s1351_s29, 4  ;;  %s1199_s10 = int_to_ptr.vmem [resolvable:$false] %s1198_s10 }
  0xad   : > { %s1200_s1 = scalar_lea.vmem %s1199_s10, 4096  ;;  %p1201_p2 = scmp.lt.s32.totalorder %s1677_s19, %s1199_s10 }
  0xae   : > { %p1196_p1 = pnand %p1194_p8, %p1537_p5  ;;  %p1202_p0 = scmp.lt.s32.totalorder %s1200_s1, %s1193_s12 }
  0xb0   : > { %p1197_p3 = pneg %p1196_p1  ;;  %p1203_p13 = por %p1202_p0, %p1201_p2 }
  0xb2   : > { %p1204_p12 = pnand %p1203_p13, %p1197_p3 }
  0xb4   : > { %1207 = shalt.err (!%p1204_p12)
}
  0xb5   : > { %s1926_s21 = smov 8   ;;  %s1927_s27 = smov 128  }
  0xb6   : > { %955 = dma.hbm_to_vmem [thread:$0]  (!%p1924_p7), %s1674_s23, 2048, %s1677_s19, %s1681_s15, %s1927_s27, %s1927_s27, %s1926_s21  }
  0xb7   : > { %p1928_p5 = scmp.ne.s32.totalorder %s1904_s11, 0 }
  0xb8   : > { %s1711_s14 = sand.u32 (!%p1928_p5), 1, %s1318_s22   ;;  %p1929_p6 = scmp.ne.s32.totalorder (!%p1928_p5), %s1898_s7, 0 }
  0xb9   : > { %297 = sbr.rel (%p1928_p5) target bundleno = 727 (0x2d7), region = 40  ;;  %s759_s9 = sshll.u32 (!%p1928_p5), %s1711_s14, 3 }
  0xba   : > { %s300_s5 = scalar_lea.sflag (!%p1928_p5), [#allocation4], %s1711_s14  ;;  %s1715_s25 = scalar_lea.vmem (!%p1928_p5), [#allocation3], %s759_s9 }
  0xc0   : > { %1281 = dma.done.wait (%p1929_p6), %s300_s5, 128  }
  0xc1   : > { %1283 = vsyncadd (%p1929_p6), %s300_s5, 4294967168  ;;  %s1930_s16 = sld [smem:[#allocation24_spill]]  ;;  %s1931_s23 = sld [smem:[#allocation18_spill]] }
  0xc2   : > { %s1932_s19 = sld [smem:[#allocation25_spill]] }
  0xc7   : > { %s308_s11 = sand.u32 1, %s1930_s16   ;;  %s310_s15 = sand.u32 1, %s1931_s23  }
  0xc8   : > { %s760_s4 = sshll.u32 %s310_s15, 7  ;;  %s309_s18 = scalar_lea.sflag [#allocation7], %s308_s11 }
  0xc9   : > { %s1723_s17 = scalar_lea.vmem [#allocation6], %s760_s4  ;;  %p1933_p7 = scmp.ne.s32.totalorder %s1932_s19, 0 }
  0xcb   : > { %1285 = dma.done.wait (%p1933_p7), %s309_s18, 2064  }
  0xcc   : > { %1287 = vsyncadd (%p1933_p7), %s309_s18, 4294965232  ;;  %s1729_s30 = scalar_lea.vmem [#allocation8], %s310_s15  ;;  %s326_s13 = scalar_lea.sflag [#allocation10], %s308_s11 }
  0xcd   : > { %s1731_s7 = scalar_lea.vmem [#allocation9], %s760_s4 }
  0xce   : > { %1289 = dma.done.wait (%p1933_p7), %s326_s13, 2048  }
  0xcf   : > { %1291 = vsyncadd (%p1933_p7), %s326_s13, 4294965248  ;;  %p1934_p4 = scmp.eq.s32.totalorder %s1930_s16, 0 }
  0xd1   : > { %1293 = dma.done.wait (%p1934_p4), [#allocation10], 16   ;;  %p1935_p9 = pmov %p1934_p4 }
  0xd2   : > { %s1741_s24 = scalar_lea.vmem [#allocation12], %s759_s9  ;;  %s1936_s12 = sld [smem:[#allocation21_spill]] }
  0xd3   : > { %1295 = vsyncadd (%p1935_p9), [#allocation10], 4294967280 }
  0xd8   : > { %p764_p10 = scmp.ne.s32.totalorder %s1936_s12, 0 }
  0xd9   : > { %v1352_v0 = vmov (!%p764_p10), 0.0  }
  0xda   : > { %378 = sbr.rel (%p764_p10) target bundleno = 225 (0xe1), region = 64  ;;  %379 = vst [vmem:[#allocation2] sm:$0xff] (!%p764_p10), %v1352_v0 }
  0xe1 PF: > { %v381_v1 = vld [vmem:[%s1723_s17] sm:$0xff]  ;;  %v382_v2 = vld [vmem:[%s1723_s17 + $0x8] sm:$0xff]  ;;  %v383_v3 = vld [vmem:[%s1723_s17 + $0x10] sm:$0xff]  ;;  %v1353_v4 = vmov 0.0|0.0   ;;  %vm1354_vm0 = vmmov 0   ;;  %v1355_v7 = vmov 0.0  }
  0xe2   : > { %877 = vmatprep.subr.bf16.mxu0 %v1353_v4  ;;  %v878_v5 = vpack.c.bf16 %v382_v2, %v381_v1  ;;  %v384_v6 = vld [vmem:[%s1723_s17 + $0x18] sm:$0xff]  ;;  %839 = vmatprep.mubr.msk.f32.mxu0 %vm1354_vm0, %v1355_v7  ;;  %v385_v9 = vld [vmem:[%s1723_s17 + $0x20] sm:$0xff]  ;;  %v386_v10 = vld [vmem:[%s1723_s17 + $0x28] sm:$0xff]  ;;  %s1937_s29 = sld [smem:[#allocation21_spill]] }
  0xe3   : > { %901 = vmatprep.subr.bf16.mxu1 %v1353_v4  ;;  %874 = vmatprep.mubr.msk.f32.mxu1 %vm1354_vm0, %v1355_v7  ;;  %v881_v8 = vpack.c.bf16 %v384_v6, %v383_v3  ;;  %v476_v11 = vld [vmem:[%s1731_s7] sm:$0xff]  ;;  %v477_v12 = vld [vmem:[%s1731_s7 + $0x8] sm:$0xff]  ;;  %v478_v13 = vld [vmem:[%s1731_s7 + $0x10] sm:$0xff]  ;;  %v884_v15 = vpack.c.bf16 %v386_v10, %v385_v9 }
  0xe4   : > { %879 = vmatpush3.bf16.msra.mxu0 %v878_v5  ;;  %v479_v14 = vld [vmem:[%s1731_s7 + $0x18] sm:$0xff]  ;;  %v902_v16 = vpack.c.bf16 %v477_v12, %v476_v11  ;;  %v387_v17 = vld [vmem:[%s1723_s17 + $0x30] sm:$0xff]  ;;  %v480_v20 = vld [vmem:[%s1731_s7 + $0x20] sm:$0xff] }
  0xe5   : > { %880 = vmatprep.subr.bf16.mxu0 %v1353_v4  ;;  %v388_v18 = vld [vmem:[%s1723_s17 + $0x38] sm:$0xff]  ;;  %v905_v19 = vpack.c.bf16 %v479_v14, %v478_v13  ;;  %v481_v21 = vld [vmem:[%s1731_s7 + $0x28] sm:$0xff]  ;;  %v389_v23 = vld [vmem:[%s1723_s17 + $0x40] sm:$0xff] }
  0xe6   : > { %903 = vmatpush3.bf16.msra.mxu1 %v902_v16  ;;  %v887_v22 = vpack.c.bf16 %v388_v18, %v387_v17  ;;  %v390_v24 = vld [vmem:[%s1723_s17 + $0x48] sm:$0xff]  ;;  %v908_v25 = vpack.c.bf16 %v481_v21, %v480_v20  ;;  %v482_v26 = vld [vmem:[%s1731_s7 + $0x30] sm:$0xff]  ;;  %v483_v27 = vld [vmem:[%s1731_s7 + $0x38] sm:$0xff] }
  0xe7   : > { %904 = vmatprep.subr.bf16.mxu1 %v1353_v4  ;;  %v890_v28 = vpack.c.bf16 %v390_v24, %v389_v23  ;;  %v391_v29 = vld [vmem:[%s1723_s17 + $0x50] sm:$0xff]  ;;  %v392_v30 = vld [vmem:[%s1723_s17 + $0x58] sm:$0xff]  ;;  %v911_v31 = vpack.c.bf16 %v483_v27, %v482_v26  ;;  %v484_v32 = vld [vmem:[%s1731_s7 + $0x40] sm:$0xff] }
  0xe8   : > { %882 = vmatpush3.bf16.msra.mxu0 %v881_v8  ;;  %v485_v33 = vld [vmem:[%s1731_s7 + $0x48] sm:$0xff]  ;;  %v893_v34 = vpack.c.bf16 %v392_v30, %v391_v29  ;;  %v393_v35 = vld [vmem:[%s1723_s17 + $0x60] sm:$0xff]  ;;  %v486_v38 = vld [vmem:[%s1731_s7 + $0x50] sm:$0xff]  ;;  %p766_p11 = scmp.ne.s32.totalorder %s1937_s29, 3 }
  0xe9   : > { %883 = vmatprep.subr.bf16.mxu0 %v1353_v4  ;;  %v394_v36 = vld [vmem:[%s1723_s17 + $0x68] sm:$0xff]  ;;  %v914_v37 = vpack.c.bf16 %v485_v33, %v484_v32  ;;  %v487_v39 = vld [vmem:[%s1731_s7 + $0x58] sm:$0xff]  ;;  %v395_v41 = vld [vmem:[%s1723_s17 + $0x70] sm:$0xff] }
  0xea   : > { %906 = vmatpush3.bf16.msra.mxu1 %v905_v19  ;;  %v896_v40 = vpack.c.bf16 %v394_v36, %v393_v35  ;;  %v396_v42 = vld [vmem:[%s1723_s17 + $0x78] sm:$0xff]  ;;  %v917_v43 = vpack.c.bf16 %v487_v39, %v486_v38  ;;  %v488_v44 = vld [vmem:[%s1731_s7 + $0x60] sm:$0xff]  ;;  %v489_v45 = vld [vmem:[%s1731_s7 + $0x68] sm:$0xff] }
  0xeb   : > { %907 = vmatprep.subr.bf16.mxu1 %v1353_v4  ;;  %v899_v46 = vpack.c.bf16 %v396_v42, %v395_v41  ;;  %v920_v47 = vpack.c.bf16 %v489_v45, %v488_v44  ;;  %v380_v48 = vld [vmem:[%s1715_s25] sm:$0xff]  ;;  %v765_v52 = vld [vmem:[%s1729_s30] ss:$0 sm:$0xff]  ;;  %v767_v62 = vld [vmem:[#allocation11] ss:$0 sm:$0xff] (!%p766_p11) }
  0xec   : > { %885 = vmatpush3.bf16.msra.mxu0 %v884_v15  ;;  %v490_v49 = vld [vmem:[%s1731_s7 + $0x70] sm:$0xff]  ;;  %v491_v50 = vld [vmem:[%s1731_s7 + $0x78] sm:$0xff]  ;;  %v475_v57 = vld [vmem:[#allocation2] sm:$0xff] }
  0xed   : > { %886 = vmatprep.subr.bf16.mxu0 %v1353_v4  ;;  %v923_v51 = vpack.c.bf16 %v491_v50, %v490_v49 }
  0xee   : > { %909 = vmatpush3.bf16.msra.mxu1 %v908_v25 }
  0xef   : > { %910 = vmatprep.subr.bf16.mxu1 %v1353_v4 }
  0xf0   : > { %888 = vmatpush3.bf16.msra.mxu0 %v887_v22 }
  0xf1   : > { %889 = vmatprep.subr.bf16.mxu0 %v1353_v4 }
  0xf2   : > { %912 = vmatpush3.bf16.msra.mxu1 %v911_v31 }
  0xf3   : > { %913 = vmatprep.subr.bf16.mxu1 %v1353_v4 }
  0xf4   : > { %891 = vmatpush3.bf16.msra.mxu0 %v890_v28 }
  0xf5   : > { %892 = vmatprep.subr.bf16.mxu0 %v1353_v4 }
  0xf6   : > { %915 = vmatpush3.bf16.msra.mxu1 %v914_v37 }
  0xf7   : > { %916 = vmatprep.subr.bf16.mxu1 %v1353_v4 }
  0xf8   : > { %894 = vmatpush3.bf16.msra.mxu0 %v893_v34 }
  0xf9   : > { %895 = vmatprep.subr.bf16.mxu0 %v1353_v4 }
  0xfa   : > { %918 = vmatpush3.bf16.msra.mxu1 %v917_v43 }
  0xfb   : > { %919 = vmatprep.subr.bf16.mxu1 %v1353_v4 }
  0xfc   : > { %897 = vmatpush3.bf16.msra.mxu0 %v896_v40 }
  0xfd   : > { %898 = vmatprep.subr.bf16.mxu0 %v1353_v4 }
  0xfe   : > { %921 = vmatpush3.bf16.msra.mxu1 %v920_v47 }
  0xff   : > { %922 = vmatprep.subr.bf16.mxu1 %v1353_v4 }
 0x100   : > { %900 = vmatpush3.bf16.msra.mxu0 %v899_v46 }
 0x102   : > { %924 = vmatpush3.bf16.msra.mxu1 %v923_v51 }
 0x103   : > { %840 = vmatmul.mubr.f32.vlgmr.msra.gmra.mrb[0].mxu0 %v380_v48 }
 0x1d6   : > { %v470_v53 = vpop.f32.mrb[0].mxu0 }
 0x1d7   : > { %v471_v54 = vadd.f32 %v765_v52, %v470_v53  ;;  %v841_v55 = vpop.f32.mrb[1].mxu0 }
 0x1d9   : > { %v474_v56 = vmax.f32 %v471_v54, 0.0 }
 0x1db   : > { %875 = vmatmul.mubr.f32.vlgmr.msra.gmra.mrb[0].mxu1 %v474_v56 }
 0x2ab   : > { %567 = sbr.rel (%p766_p11) target bundleno = 700 (0x2bc), region = 68 }
 0x2ae   : > { %v558_v58 = vpop.f32.mrb[0].mxu1 }
 0x2af   : > { %v562_v59 = vadd.f32 %v558_v58, %v475_v57  ;;  %v876_v60 = vpop.f32.mrb[1].mxu1 }
 0x2b1   : > { %563 = vst [vmem:[#allocation2] sm:$0xff] %v562_v59 }
 0x2b8   : > { %v568_v61 = vld [vmem:[#allocation2] sm:$0xff] }
 0x2b9   : > { %v576_v63 = vadd.f32 %v767_v62, %v568_v61 }
 0x2bb   : > { %577 = vst [vmem:[%s1741_s24] sm:$0xff] %v576_v63 }
 0x2bc PF: > { %s1938_s10 = sld [smem:[#allocation22_spill]]  ;;  %s1939_s9 = sld [smem:[#allocation32_spill]] }
 0x2bd   : > { %s592_s25 = sshll.u32 %s1741_s24, 4  ;;  %s579_s16 = scalar_lea.sflag [#allocation5], %s1711_s14  ;;  %s593_s25 = int_to_ptr.vmem [resolvable:$true] %s592_s25 }
 0x2be   : > { %s1208_s23 = scalar_lea.vmem %s593_s25, 128  ;;  %p1940_p1 = scmp.ne.s32.totalorder %s1916_s6, 0 }
 0x2bf   : > { %p1209_p8 = scmp.ne.s32.totalorder %s593_s25, %s1208_s23  ;;  %s1356_s19 = smov [#allocation12]  }
 0x2c0   : > { %s1212_s11 = sshll.u32 %s1356_s19, 4  ;;  %s1213_s11 = int_to_ptr.vmem [resolvable:$false] %s1212_s11 }
 0x2c1   : > { %p1210_p3 = pnand %p1209_p8, %p1940_p1  ;;  %s1214_s15 = scalar_lea.vmem %s1213_s11, 256 }
 0x2c2   : > { %s769_s1 = sshll.u32 %s1938_s10, 7  ;;  %p1215_p0 = scmp.lt.s32.totalorder %s593_s25, %s1213_s11 }
 0x2c3   : > { %s1800_s5 = scalar_lea.hbm %s1939_s9, %s769_s1  ;;  %p1211_p2 = pneg %p1210_p3 }
 0x2c4   : > { %p1216_p13 = scmp.lt.s32.totalorder %s1214_s15, %s1208_s23 }
 0x2c6   : > { %p1217_p12 = por %p1216_p13, %p1215_p0 }
 0x2c8   : > { %p1218_p5 = pnand %p1217_p12, %p1211_p2 }
 0x2ca   : > { %1221 = shalt.err (!%p1218_p5)
}
 0x2cb   : > { %s1222_s14 = scalar_lea.hbm %s1800_s5, 128  ;;  %s1226_s17 = scalar_lea.hbm %s1939_s9, 256 }
 0x2cc   : > { %p1223_p6 = scmp.ne.s32.totalorder %s1800_s5, %s1222_s14  ;;  %p1227_p9 = scmp.lt.u32.totalorder %s1800_s5, %s1939_s9 }
 0x2cd   : > { %p1228_p10 = scmp.lt.u32.totalorder %s1226_s17, %s1222_s14  ;;  %p1230_p8 = scmp.lt.u32.totalorder %s1222_s14, %s1800_s5 }
 0x2ce   : > { %p1224_p7 = pnand %p1223_p6, %p1940_p1 }
 0x2cf   : > { %p1229_p11 = por %p1228_p10, %p1227_p9 }
 0x2d0   : > { %p1225_p4 = pneg %p1224_p7 }
 0x2d1   : > { %p1231_p3 = por %p1230_p8, %p1229_p11 }
 0x2d3   : > { %p1232_p2 = pnand %p1231_p3, %p1225_p4 }
 0x2d5   : > { %1235 = shalt.err (!%p1232_p2)
}
 0x2d6   : > { %937 = dma.vmem_to_hbm [thread:$0]  (%p1940_p1), %s593_s25, 128, %s1800_s5, %s579_s16  }
 0x2d7 PF: > { %s1941_s7 = sld [smem:[#allocation19_spill]]  ;;  %s1942_s24 = sld [smem:[#allocation26_spill]] }
 0x2d8   : > { %p963_p0 = scmp.ge.s32.totalorder %s1342_s28, 2 }
 0x2dd   : > { %s604_s12 = sand.u32 1, %s1941_s7   ;;  %p1943_p13 = scmp.ne.s32.totalorder %s1942_s24, 0 }
 0x2de   : > { %s605_s29 = scalar_lea.sflag [#allocation5], %s604_s12 }
 0x2df   : > { %p957_p12 = pnand %p963_p0, %p1943_p13 }
 0x2e1   : > { %1297 = dma.done.wait (!%p957_p12), %s605_s29, 128  }
 0x2e2   : > { %1299 = vsyncadd (!%p957_p12), %s605_s29, 4294967168  ;;  %s27_s28 = sadd.s32 1, %s1342_s28   ;;  %s1944_s18 = sld [smem:[#allocation18_spill]] }
 0x2e3   : > { %p24_p5 = scmp.ge.s32.totalorder %s27_s28, 10   ;;  %s1945_s6 = sld [smem:[#allocation20_spill]] }
 0x2e4   : > { %s1946_s23 = sld [smem:[#allocation29_spill]]  ;;  %s1947_s25 = sld [smem:[#allocation23_spill]] }
 0x2e5   : > { %s1948_s10 = sld [smem:[#allocation27_spill]]  ;;  %s1949_s27 = sld [smem:[#allocation28_spill]] }
 0x2e6   : > { %s1950_s19 = smov %s1310_s20  ;;  %s1951_s20 = smov %s1591_s8 }
 0x2e7   : > { %s1952_s21 = smov %s1318_s22  ;;  %s1954_s24 = smov %s1334_s26 }
 0x2e8   :  { %26 = sbr.rel (!%p24_p5) target bundleno = 17 (0x11), region = 134 }
 0x2e9   : > { %s1953_s22 = smov %s1945_s6 }
 0x2eb   : > { %s1955_s26 = smov %s1948_s10 }
 0x2ef   :  { %610 = vsyncpa [#allocation4], 1 }
 0x2f0   :  { %612 = vsyncpa [#allocation4 + $0x1], 1 }
 0x2f1   :  { %613 = vsyncpa [#allocation7], 1 }
 0x2f2   :  { %615 = vsyncpa [#allocation7 + $0x1], 1 }
 0x2f3   :  { %616 = vsyncpa [#allocation10], 1 }
 0x2f4   :  { %618 = vsyncpa [#allocation10 + $0x1], 1 }
 0x2f5   :  { %619 = vsyncpa [#allocation5], 1 }
 0x2f6   :  { %621 = vsyncpa [#allocation5 + $0x1], 1 }

</bundles_post_ra>
